<compile_context>
chip_gen: v5e
topology: v5e:2x2
jax: 0.10.0
libtpu: 0.0.40
codegen_flags: <defaults>
</compile_context>

<pallas_src>
import jax
import jax.numpy as jnp
from jax.experimental import pallas as pl
from jax.experimental.pallas import tpu as pltpu


_VMEM_LIMIT = 48 * 1024 * 1024


# ----------------------------------------------------------------------------
# tiling plan: pad N so the chosen tiles always divide it
# ----------------------------------------------------------------------------
def _round_up(x, m):
    return (x + m - 1) // m * m


def _plan(n, *, tq_big=512, ts_big=1024):
    """Return (n_pad, tq, ts) with n_pad a multiple of both tq and ts."""
    if n >= ts_big:
        return _round_up(n, ts_big), tq_big, ts_big
    t = min(tq_big, _round_up(n, 128))
    return _round_up(n, t), t, t


# ----------------------------------------------------------------------------
# Kernel 1: fused per-layer linear transform
#   xw    = x @ W_feat              (N, H*C)  bf16   (lane-packed heads)
#   asrc  = x @ W_asrc              (N, H)    f32    (att_src folded into W)
#   adst  = x @ W_adst              (N, H)    f32    (att_dst folded into W)
#   xres  = x @ W_res   [optional]  (N, H*C)  bf16   (residual projection)
# ----------------------------------------------------------------------------
def _linear_kernel_id(x_ref, wf_ref, was_ref, wad_ref,
                      xw_ref, asrc_ref, adst_ref):
    x = x_ref[...]
    xw_ref[...] = jnp.dot(x, wf_ref[...],
                          preferred_element_type=jnp.float32).astype(xw_ref.dtype)
    asrc_ref[...] = jnp.dot(x, was_ref[...], preferred_element_type=jnp.float32)
    adst_ref[...] = jnp.dot(x, wad_ref[...], preferred_element_type=jnp.float32)


def _linear_kernel_proj(x_ref, wf_ref, wr_ref, was_ref, wad_ref,
                        xw_ref, asrc_ref, adst_ref, xres_ref):
    x = x_ref[...]
    xw_ref[...] = jnp.dot(x, wf_ref[...],
                          preferred_element_type=jnp.float32).astype(xw_ref.dtype)
    asrc_ref[...] = jnp.dot(x, was_ref[...], preferred_element_type=jnp.float32)
    adst_ref[...] = jnp.dot(x, wad_ref[...], preferred_element_type=jnp.float32)
    xres_ref[...] = jnp.dot(x, wr_ref[...],
                            preferred_element_type=jnp.float32).astype(xres_ref.dtype)


def fused_linear(x, p, *, tm):
    n_pad, f_in = x.shape
    hc = p["W_feat"].shape[1]
    h = p["W_asrc"].shape[1]

    def row_spec(width):
        return pl.BlockSpec((tm, width), lambda i: (i, 0))

    def full_spec(arr):
        return pl.BlockSpec(arr.shape, lambda i: (0, 0))

    out_shapes = [jax.ShapeDtypeStruct((n_pad, hc), jnp.bfloat16),
                  jax.ShapeDtypeStruct((n_pad, h), jnp.float32),
                  jax.ShapeDtypeStruct((n_pad, h), jnp.float32)]
    out_specs = [row_spec(hc), row_spec(h), row_spec(h)]

    if p["W_res"] is None:
        kernel = _linear_kernel_id
        inputs = (x, p["W_feat"], p["W_asrc"], p["W_adst"])
        in_specs = [row_spec(f_in), full_spec(p["W_feat"]),
                    full_spec(p["W_asrc"]), full_spec(p["W_adst"])]
    else:
        kernel = _linear_kernel_proj
        inputs = (x, p["W_feat"], p["W_res"], p["W_asrc"], p["W_adst"])
        in_specs = [row_spec(f_in), full_spec(p["W_feat"]), full_spec(p["W_res"]),
                    full_spec(p["W_asrc"]), full_spec(p["W_adst"])]
        out_shapes.append(jax.ShapeDtypeStruct((n_pad, hc), jnp.bfloat16))
        out_specs.append(row_spec(hc))

    outs = pl.pallas_call(
        kernel,
        out_shape=tuple(out_shapes),
        grid=(n_pad // tm,),
        in_specs=in_specs,
        out_specs=tuple(out_specs),
        compiler_params=pltpu.CompilerParams(
            dimension_semantics=("parallel",),
            vmem_limit_bytes=_VMEM_LIMIT),
    )(*inputs)

    if p["W_res"] is None:
        xw, asrc, adst = outs
        return xw, asrc, adst, None
    xw, asrc, adst, xres = outs
    return xw, asrc, adst, xres


# ----------------------------------------------------------------------------
# Kernel 2: flash-tiled GAT attention (all heads per mask tile) + fused epilogue
#   mode "bn_relu":     out = ReLU(BN(attn + residual + bias))       bf16
#   mode "logsoftmax":  out = log_softmax(attn + residual + bias)    f32
# ----------------------------------------------------------------------------
def _make_attn_kernel(heads, ch, apply_bn):
    def kernel(xws_ref, adst_ref, asrc_ref, mask_ref, res_ref, bias_ref, *rest):
        if apply_bn:
            (gamma_ref, beta_ref, mean_ref, var_ref,
             o_ref, m_sc, l_sc, acc_sc) = rest
        else:
            o_ref, m_sc, l_sc, acc_sc = rest

        si = pl.program_id(1)

        @pl.when(si == 0)
        def _init():
            m_sc[...] = jnp.full_like(m_sc, -1e30)
            l_sc[...] = jnp.zeros_like(l_sc)
            acc_sc[...] = jnp.zeros_like(acc_sc)

        # One int8 mask tile, shared across all heads.
        edge = mask_ref[...] != 0                       # (tq, ts) bool
        a_d = adst_ref[...]                             # (tq, H) f32
        a_s_t = asrc_ref[...].T                         # (H, ts) f32 (tiny transpose)

        for hh in range(heads):
            logits = a_d[:, hh:hh + 1] + a_s_t[hh:hh + 1, :]       # (tq, ts)
            e = jnp.where(logits > 0, logits, 0.2 * logits)        # LeakyReLU(0.2)
            e = jnp.where(edge, e, -1e30)                          # mask non-edges
            m_prev = m_sc[hh]
            m_new = jnp.maximum(m_prev, jnp.max(e, axis=-1, keepdims=True))
            corr = jnp.exp(m_prev - m_new)
            p = jnp.exp(e - m_new)                                 # 0 for non-edges
            l_sc[hh] = corr * l_sc[hh] + jnp.sum(p, axis=-1, keepdims=True)
            acc_sc[hh] = corr * acc_sc[hh] + jnp.dot(
                p.astype(jnp.bfloat16), xws_ref[:, hh * ch:(hh + 1) * ch],
                preferred_element_type=jnp.float32)
            m_sc[hh] = m_new

        @pl.when(si == pl.num_programs(1) - 1)
        def _finish():
            cols = []
            for hh in range(heads):
                # Rows with no incoming edge: running max never left -1e30.
                has_edge = m_sc[hh] > -1e29
                inv = jnp.where(has_edge, 1.0 / l_sc[hh], 0.0)
                cols.append(acc_sc[hh] * inv)                      # (tq, C)
            y = cols[0] if heads == 1 else jnp.concatenate(cols, axis=-1)
            y = y + res_ref[...].astype(jnp.float32) + bias_ref[...]
            if apply_bn:
                inv_std = jax.lax.rsqrt(var_ref[...] + 1e-5)
                y = (y - mean_ref[...]) * inv_std * gamma_ref[...] + beta_ref[...]
                y = jnp.maximum(y, 0.0)
            else:
                mx = jnp.max(y, axis=-1, keepdims=True)
                z = y - mx
                y = z - jnp.log(jnp.sum(jnp.exp(z), axis=-1, keepdims=True))
            o_ref[...] = y.astype(o_ref.dtype)

    return kernel


def gat_attention(xw, asrc, adst, mask, res, bias, bn, *,
                  heads, ch, mode, out_dtype, tq, ts):
    n_pad, hc = xw.shape
    apply_bn = mode == "bn_relu"

    in_specs = [
        pl.BlockSpec((ts, hc), lambda qi, si: (si, 0)),        # src features
        pl.BlockSpec((tq, heads), lambda qi, si: (qi, 0)),     # alpha_dst
        pl.BlockSpec((ts, heads), lambda qi, si: (si, 0)),     # alpha_src
        pl.BlockSpec((tq, ts), lambda qi, si: (qi, si)),       # adjacency (int8)
        pl.BlockSpec((tq, hc), lambda qi, si: (qi, 0)),        # residual (dst rows)
        pl.BlockSpec((1, hc), lambda qi, si: (0, 0)),          # bias
    ]
    inputs = [xw, adst, asrc, mask, res, bias]
    if apply_bn:
        in_specs += [pl.BlockSpec((1, hc), lambda qi, si: (0, 0)) for _ in range(4)]
        inputs += [bn["gamma"], bn["beta"], bn["mean"], bn["var"]]

    # TODO(synk): optional block-sparsity skip of empty (tq, ts) mask tiles via
    # PrefetchScalarGridSpec, and pl.Buffered(3) on the mask stream for v7x.
    return pl.pallas_call(
        _make_attn_kernel(heads, ch, apply_bn),
        out_shape=jax.ShapeDtypeStruct((n_pad, hc), out_dtype),
        grid=(n_pad // tq, n_pad // ts),
        in_specs=in_specs,
        out_specs=pl.BlockSpec((tq, hc), lambda qi, si: (qi, 0)),
        scratch_shapes=[pltpu.VMEM((heads, tq, 1), jnp.float32),   # running max
                        pltpu.VMEM((heads, tq, 1), jnp.float32),   # running sum
                        pltpu.VMEM((heads, tq, ch), jnp.float32)], # accumulator
        compiler_params=pltpu.CompilerParams(
            dimension_semantics=("parallel", "arbitrary"),
            vmem_limit_bytes=_VMEM_LIMIT),
    )(*inputs)


# ----------------------------------------------------------------------------
# Parameter setup + layer composition
# ----------------------------------------------------------------------------
def init_gat_params(key, in_channels, hidden_channels, out_channels,
                    num_layers, num_heads):
    layers = []
    f_in = in_channels
    for li in range(num_layers):
        last = li == num_layers - 1
        H = 1 if last else num_heads
        C = out_channels if last else hidden_channels
        hc = H * C
        key, k1, k2, k3, k4 = jax.random.split(key, 5)
        scale = 1.0 / (f_in ** 0.5)

        W = jax.random.normal(k1, (f_in, hc), jnp.float32) * scale
        att_src = 0.1 * jax.random.normal(k2, (H, C), jnp.float32)
        att_dst = 0.1 * jax.random.normal(k3, (H, C), jnp.float32)
        # Fold attention vectors into the input projection:
        #   alpha_src[n, h] = (x @ W)[n, h*C:(h+1)*C] @ att_src[h]
        W3 = W.reshape(f_in, H, C)
        w_asrc = jnp.einsum("fhc,hc->fh", W3, att_src)
        w_adst = jnp.einsum("fhc,hc->fh", W3, att_dst)

        if f_in == hc:
            w_res = None                                   # identity residual
        else:
            w_res = jax.random.normal(k4, (f_in, hc), jnp.float32) * scale

        layer = dict(
            W_feat=W.astype(jnp.bfloat16),
            W_asrc=w_asrc.astype(jnp.bfloat16),
            W_adst=w_adst.astype(jnp.bfloat16),
            W_res=None if w_res is None else w_res.astype(jnp.bfloat16),
            bias=jnp.zeros((1, hc), jnp.float32),
            H=H, C=C)
        if not last:
            layer["bn"] = dict(gamma=jnp.ones((1, hc), jnp.float32),
                               beta=jnp.zeros((1, hc), jnp.float32),
                               mean=jnp.zeros((1, hc), jnp.float32),
                               var=jnp.ones((1, hc), jnp.float32))
        layers.append(layer)
        f_in = hc
    return layers


def gat_forward(x, adj_mask, params):
    """x: (N, F_in) f32; adj_mask: (N, N) int8, adj_mask[dst, src]=1 iff edge."""
    # TODO(synk): training-time edge_drop (randperm over sparse nnz) and all
    # dropouts are inference no-ops here; BatchNorm uses running statistics.
    n, f_in = x.shape
    n_pad, tq, ts = _plan(n)

    cur = jnp.zeros((n_pad, f_in), jnp.bfloat16).at[:n, :].set(x.astype(jnp.bfloat16))
    mask = jnp.zeros((n_pad, n_pad), jnp.int8).at[:n, :n].set(adj_mask.astype(jnp.int8))

    num_layers = len(params)
    for li, p in enumerate(params):
        last = li == num_layers - 1
        xw, asrc, adst, xres = fused_linear(cur, p, tm=tq)
        res = cur if xres is None else xres
        cur = gat_attention(
            xw, asrc, adst, mask, res, p["bias"], p.get("bn"),
            heads=p["H"], ch=p["C"],
            mode="logsoftmax" if last else "bn_relu",
            out_dtype=jnp.float32 if last else jnp.bfloat16,
            tq=tq, ts=ts)
    return cur[:n]


# ----------------------------------------------------------------------------
if __name__ == "__main__":
    N = 64
    in_channels, hidden_channels, out_channels = 32, 16, 8
    num_layers, num_heads = 3, 4

    key = jax.random.PRNGKey(0)
    key, kx, ka, kp = jax.random.split(key, 4)

    x = jax.random.normal(kx, (N, in_channels), jnp.float32)

    # Dense 0/1 adjacency (int8): random sparse edges + a ring so most dst
    # nodes have incoming edges; add_self_loops=False -> zero diagonal.
    A = (jax.random.uniform(ka, (N, N)) < 0.1).astype(jnp.int8)
    A = A * (1 - jnp.eye(N, dtype=jnp.int8))
    ring = jnp.roll(jnp.eye(N, dtype=jnp.int8), 1, axis=0)
    adj = jnp.clip(A + ring, 0, 1).astype(jnp.int8)

    params = init_gat_params(kp, in_channels, hidden_channels, out_channels,
                             num_layers, num_heads)

    out = gat_forward(x, adj, params)
    out = jax.block_until_ready(out)
    assert out.shape == (N, out_channels)
    assert bool(jnp.all(jnp.isfinite(out)))
    print("KERNEL_OK")
</pallas_src>

<mosaic_0001>
module attributes {stable_mosaic.version = 11 : i64} {
  func.func @_linear_kernel_proj(%arg0: i32, %arg1: memref<128x32xbf16, #tpu.memory_space<vmem>>, %arg2: memref<32x64xbf16, #tpu.memory_space<vmem>>, %arg3: memref<32x64xbf16, #tpu.memory_space<vmem>>, %arg4: memref<32x4xbf16, #tpu.memory_space<vmem>>, %arg5: memref<32x4xbf16, #tpu.memory_space<vmem>>, %arg6: memref<128x64xbf16, #tpu.memory_space<vmem>>, %arg7: memref<128x4xf32, #tpu.memory_space<vmem>>, %arg8: memref<128x4xf32, #tpu.memory_space<vmem>>, %arg9: memref<128x64xbf16, #tpu.memory_space<vmem>>) attributes {dimension_semantics = [#tpu.dimension_semantics<parallel>], iteration_bounds = array<i64: 1>, scalar_prefetch = 0 : i64, scratch_operands = 0 : i64, tpu.core_type = #tpu.core_type<tc>, window_params = [{transform_indices = @transform_0, window_bounds = array<i64: 128, 32>}, {pipeline_mode = #tpu.pipeline_mode<synchronous>, transform_indices = @transform_1, window_bounds = array<i64: 32, 64>}, {pipeline_mode = #tpu.pipeline_mode<synchronous>, transform_indices = @transform_2, window_bounds = array<i64: 32, 64>}, {pipeline_mode = #tpu.pipeline_mode<synchronous>, transform_indices = @transform_3, window_bounds = array<i64: 32, 4>}, {pipeline_mode = #tpu.pipeline_mode<synchronous>, transform_indices = @transform_4, window_bounds = array<i64: 32, 4>}, {transform_indices = @transform_5, window_bounds = array<i64: 128, 64>}, {transform_indices = @transform_6, window_bounds = array<i64: 128, 4>}, {transform_indices = @transform_7, window_bounds = array<i64: 128, 4>}, {transform_indices = @transform_8, window_bounds = array<i64: 128, 64>}]} {
    %c0 = arith.constant 0 : index
    %c0_0 = arith.constant 0 : index
    %0 = vector.load %arg1[%c0, %c0_0] : memref<128x32xbf16, #tpu.memory_space<vmem>>, vector<128x32xbf16>
    %c0_1 = arith.constant 0 : index
    %c0_2 = arith.constant 0 : index
    %1 = vector.load %arg2[%c0_1, %c0_2] : memref<32x64xbf16, #tpu.memory_space<vmem>>, vector<32x64xbf16>
    %cst = arith.constant dense<0.000000e+00> : vector<128x64xf32>
    %2 = tpu.matmul %0, %1, %cst {dimension_numbers = #tpu.dot_dimension_numbers<[1], [0], [0], [1], [0, 0, 1, 1], [], []>} : vector<128x32xbf16>, vector<32x64xbf16>, vector<128x64xf32> -> vector<128x64xf32>
    %3 = arith.truncf %2 : vector<128x64xf32> to vector<128x64xbf16>
    %c0_3 = arith.constant 0 : index
    %c0_4 = arith.constant 0 : index
    %4 = vector.load %arg6[%c0_3, %c0_4] : memref<128x64xbf16, #tpu.memory_space<vmem>>, vector<128x64xbf16>
    tpu.vector_store %arg6[%c0_3, %c0_4], %3 {strides = array<i32>} : memref<128x64xbf16, #tpu.memory_space<vmem>>, vector<128x64xbf16>,
    %c0_5 = arith.constant 0 : index
    %c0_6 = arith.constant 0 : index
    %5 = vector.load %arg4[%c0_5, %c0_6] : memref<32x4xbf16, #tpu.memory_space<vmem>>, vector<32x4xbf16>
    %cst_7 = arith.constant dense<0.000000e+00> : vector<128x4xf32>
    %6 = tpu.matmul %0, %5, %cst_7 {dimension_numbers = #tpu.dot_dimension_numbers<[1], [0], [0], [1], [0, 0, 1, 1], [], []>} : vector<128x32xbf16>, vector<32x4xbf16>, vector<128x4xf32> -> vector<128x4xf32>
    %c0_8 = arith.constant 0 : index
    %c0_9 = arith.constant 0 : index
    %7 = vector.load %arg7[%c0_8, %c0_9] : memref<128x4xf32, #tpu.memory_space<vmem>>, vector<128x4xf32>
    tpu.vector_store %arg7[%c0_8, %c0_9], %6 {strides = array<i32>} : memref<128x4xf32, #tpu.memory_space<vmem>>, vector<128x4xf32>,
    %c0_10 = arith.constant 0 : index
    %c0_11 = arith.constant 0 : index
    %8 = vector.load %arg5[%c0_10, %c0_11] : memref<32x4xbf16, #tpu.memory_space<vmem>>, vector<32x4xbf16>
    %cst_12 = arith.constant dense<0.000000e+00> : vector<128x4xf32>
    %9 = tpu.matmul %0, %8, %cst_12 {dimension_numbers = #tpu.dot_dimension_numbers<[1], [0], [0], [1], [0, 0, 1, 1], [], []>} : vector<128x32xbf16>, vector<32x4xbf16>, vector<128x4xf32> -> vector<128x4xf32>
    %c0_13 = arith.constant 0 : index
    %c0_14 = arith.constant 0 : index
    %10 = vector.load %arg8[%c0_13, %c0_14] : memref<128x4xf32, #tpu.memory_space<vmem>>, vector<128x4xf32>
    tpu.vector_store %arg8[%c0_13, %c0_14], %9 {strides = array<i32>} : memref<128x4xf32, #tpu.memory_space<vmem>>, vector<128x4xf32>,
    %c0_15 = arith.constant 0 : index
    %c0_16 = arith.constant 0 : index
    %11 = vector.load %arg3[%c0_15, %c0_16] : memref<32x64xbf16, #tpu.memory_space<vmem>>, vector<32x64xbf16>
    %cst_17 = arith.constant dense<0.000000e+00> : vector<128x64xf32>
    %12 = tpu.matmul %0, %11, %cst_17 {dimension_numbers = #tpu.dot_dimension_numbers<[1], [0], [0], [1], [0, 0, 1, 1], [], []>} : vector<128x32xbf16>, vector<32x64xbf16>, vector<128x64xf32> -> vector<128x64xf32>
    %13 = arith.truncf %12 : vector<128x64xf32> to vector<128x64xbf16>
    %c0_18 = arith.constant 0 : index
    %c0_19 = arith.constant 0 : index
    %14 = vector.load %arg9[%c0_18, %c0_19] : memref<128x64xbf16, #tpu.memory_space<vmem>>, vector<128x64xbf16>
    tpu.vector_store %arg9[%c0_18, %c0_19], %13 {strides = array<i32>} : memref<128x64xbf16, #tpu.memory_space<vmem>>, vector<128x64xbf16>,
    return
  }
  func.func @transform_0(%arg0: i32) -> (i32, i32) {
    %c0_i32 = arith.constant 0 : i32
    %c0_i32_0 = arith.constant 0 : i32
    return %arg0, %c0_i32 : i32, i32
  }
  func.func @transform_1(%arg0: i32) -> (i32, i32) {
    %c0_i32 = arith.constant 0 : i32
    %c0_i32_0 = arith.constant 0 : i32
    %c0_i32_1 = arith.constant 0 : i32
    return %c0_i32, %c0_i32_0 : i32, i32
  }
  func.func @transform_2(%arg0: i32) -> (i32, i32) {
    %c0_i32 = arith.constant 0 : i32
    %c0_i32_0 = arith.constant 0 : i32
    %c0_i32_1 = arith.constant 0 : i32
    return %c0_i32, %c0_i32_0 : i32, i32
  }
  func.func @transform_3(%arg0: i32) -> (i32, i32) {
    %c0_i32 = arith.constant 0 : i32
    %c0_i32_0 = arith.constant 0 : i32
    %c0_i32_1 = arith.constant 0 : i32
    return %c0_i32, %c0_i32_0 : i32, i32
  }
  func.func @transform_4(%arg0: i32) -> (i32, i32) {
    %c0_i32 = arith.constant 0 : i32
    %c0_i32_0 = arith.constant 0 : i32
    %c0_i32_1 = arith.constant 0 : i32
    return %c0_i32, %c0_i32_0 : i32, i32
  }
  func.func @transform_5(%arg0: i32) -> (i32, i32) {
    %c0_i32 = arith.constant 0 : i32
    %c0_i32_0 = arith.constant 0 : i32
    return %arg0, %c0_i32 : i32, i32
  }
  func.func @transform_6(%arg0: i32) -> (i32, i32) {
    %c0_i32 = arith.constant 0 : i32
    %c0_i32_0 = arith.constant 0 : i32
    return %arg0, %c0_i32 : i32, i32
  }
  func.func @transform_7(%arg0: i32) -> (i32, i32) {
    %c0_i32 = arith.constant 0 : i32
    %c0_i32_0 = arith.constant 0 : i32
    return %arg0, %c0_i32 : i32, i32
  }
  func.func @transform_8(%arg0: i32) -> (i32, i32) {
    %c0_i32 = arith.constant 0 : i32
    %c0_i32_0 = arith.constant 0 : i32
    return %arg0, %c0_i32 : i32, i32
  }
}

</mosaic_0001>

<bundles_post_ra>
// kernel: tpu_custom_call.1
= control target key start
LH: loop header
LB: loop body
LE: loop exit
PB: predicated region body
PF: predicated region fallthrough
CT: control target
= control target key end

     0   :  { %vm97_vm0 = vcmask 261120   ;;  %vm269_vm1 = vcmask 31744   ;;  %vm187_vm2 = vcmask 519168   ;;  %s973_s1 = inlined_call_operand.vmem [shape: bf16[32,64], index: 1, kind: input, shape index: {}]   ;;  %s974_s3 = inlined_call_operand.vmem [shape: bf16[32,4], index: 3, kind: input, shape index: {}]   ;;  %s975_s4 = inlined_call_operand.vmem [shape: bf16[32,4], index: 4, kind: input, shape index: {}]   ;;  %s976_s2 = inlined_call_operand.vmem [shape: bf16[32,64], index: 2, kind: input, shape index: {}]   ;;  %s977_s0 = inlined_call_operand.vmem [shape: bf16[128,32], index: 0, kind: input, shape index: {}]   ;;  %s978_s6 = inlined_call_operand.vmem [shape: f32[128,4], index: 6, kind: output, shape index: {1}]   ;;  %s979_s5 = inlined_call_operand.vmem [shape: bf16[128,64], index: 5, kind: output, shape index: {0}]   ;;  %s980_s7 = inlined_call_operand.vmem [shape: f32[128,4], index: 7, kind: output, shape index: {2}]   ;;  %s981_s8 = inlined_call_operand.vmem [shape: bf16[128,64], index: 8, kind: output, shape index: {3}]  }
   0x1   :  { %v585_v0 = vld [vmem:[%s973_s1 + $0x8] sm:$0xff]  ;;  %v584_v4 = vld [vmem:[%s973_s1] sm:$0xff]  ;;  %v578_v10 = vld [vmem:[%s977_s0 + $0x10] sm:$0xff] }
   0x2   :  { %v587_v1 = vld [vmem:[%s974_s3 + $0x8] sm:$0xff]  ;;  %128 = vmatpush.bf16.msra.mxu0 %v585_v0  ;;  %v586_v5 = vld [vmem:[%s974_s3] sm:$0xff]  ;;  %v579_v11 = vld [vmem:[%s977_s0 + $0x18] sm:$0xff] }
   0x3   :  { %v589_v2 = vld [vmem:[%s975_s4 + $0x8] sm:$0xff]  ;;  %226 = vmatpush.bf16.msra.mxu1 %v587_v1  ;;  %v588_v6 = vld [vmem:[%s975_s4] sm:$0xff]  ;;  %v582_v14 = vld [vmem:[%s977_s0 + $0x30] sm:$0xff] }
   0x4   :  { %v591_v3 = vld [vmem:[%s976_s2 + $0x8] sm:$0xff]  ;;  %308 = vmatpush.bf16.msra.mxu2 %v589_v2  ;;  %v590_v7 = vld [vmem:[%s976_s2] sm:$0xff]  ;;  %v583_v15 = vld [vmem:[%s977_s0 + $0x38] sm:$0xff] }
   0x5   :  { %389 = vmatpush.bf16.msra.mxu3 %v591_v3  ;;  %v576_v8 = vld [vmem:[%s977_s0] sm:$0xff]  ;;  %v577_v9 = vld [vmem:[%s977_s0 + $0x8] sm:$0xff] }
   0x6   :  { %129 = vmatpush.bf16.msra.mxu0 %v584_v4  ;;  %v580_v12 = vld [vmem:[%s977_s0 + $0x20] sm:$0xff]  ;;  %v581_v13 = vld [vmem:[%s977_s0 + $0x28] sm:$0xff] }
   0x7   :  { %227 = vmatpush.bf16.msra.mxu1 %v586_v5 }
   0x8   :  { %309 = vmatpush.bf16.msra.mxu2 %v588_v6 }
   0x9   :  { %390 = vmatpush.bf16.msra.mxu3 %v590_v7  ;;  %520 = vmatmul.msk.bf16.vlgmr.msra.gmra.mxu0 %vm97_vm0, %v576_v8 }
   0xa   :  { %536 = vmatmul.msk.bf16.vlgmr.msra.gmra.mxu1 %vm97_vm0, %v576_v8 }
   0xb   :  { %552 = vmatmul.msk.bf16.vlgmr.msra.gmra.mxu2 %vm97_vm0, %v576_v8 }
   0xc   :  { %568 = vmatmul.msk.bf16.vlgmr.msra.gmra.mxu3 %vm97_vm0, %v576_v8 }
  0x19   :  { %521 = vmatmul.msk.bf16.gmra.mxu0 %vm97_vm0, %v577_v9 }
  0x1a   :  { %537 = vmatmul.msk.bf16.gmra.mxu1 %vm97_vm0, %v577_v9 }
  0x1b   :  { %553 = vmatmul.msk.bf16.gmra.mxu2 %vm97_vm0, %v577_v9 }
  0x1c   :  { %569 = vmatmul.msk.bf16.gmra.mxu3 %vm97_vm0, %v577_v9 }
  0x29   :  { %522 = vmatmul.msk.bf16.gmra.mxu0 %vm97_vm0, %v578_v10 }
  0x2a   :  { %538 = vmatmul.msk.bf16.gmra.mxu1 %vm97_vm0, %v578_v10 }
  0x2b   :  { %554 = vmatmul.msk.bf16.gmra.mxu2 %vm97_vm0, %v578_v10 }
  0x2c   :  { %570 = vmatmul.msk.bf16.gmra.mxu3 %vm97_vm0, %v578_v10 }
  0x39   :  { %523 = vmatmul.msk.bf16.gmra.mxu0 %vm97_vm0, %v579_v11 }
  0x3a   :  { %539 = vmatmul.msk.bf16.gmra.mxu1 %vm97_vm0, %v579_v11 }
  0x3b   :  { %555 = vmatmul.msk.bf16.gmra.mxu2 %vm97_vm0, %v579_v11 }
  0x3c   :  { %571 = vmatmul.msk.bf16.gmra.mxu3 %vm97_vm0, %v579_v11 }
  0x49   :  { %524 = vmatmul.msk.bf16.gmra.mxu0 %vm97_vm0, %v580_v12 }
  0x4a   :  { %540 = vmatmul.msk.bf16.gmra.mxu1 %vm97_vm0, %v580_v12 }
  0x4b   :  { %556 = vmatmul.msk.bf16.gmra.mxu2 %vm97_vm0, %v580_v12 }
  0x4c   :  { %572 = vmatmul.msk.bf16.gmra.mxu3 %vm97_vm0, %v580_v12 }
  0x59   :  { %525 = vmatmul.msk.bf16.gmra.mxu0 %vm97_vm0, %v581_v13 }
  0x5a   :  { %541 = vmatmul.msk.bf16.gmra.mxu1 %vm97_vm0, %v581_v13 }
  0x5b   :  { %557 = vmatmul.msk.bf16.gmra.mxu2 %vm97_vm0, %v581_v13 }
  0x5c   :  { %573 = vmatmul.msk.bf16.gmra.mxu3 %vm97_vm0, %v581_v13 }
  0x69   :  { %526 = vmatmul.msk.bf16.gmra.mxu0 %vm97_vm0, %v582_v14 }
  0x6a   :  { %542 = vmatmul.msk.bf16.gmra.mxu1 %vm97_vm0, %v582_v14 }
  0x6b   :  { %558 = vmatmul.msk.bf16.gmra.mxu2 %vm97_vm0, %v582_v14 }
  0x6c   :  { %574 = vmatmul.msk.bf16.gmra.mxu3 %vm97_vm0, %v582_v14 }
  0x79   :  { %527 = vmatmul.msk.bf16.gmra.mxu0 %vm97_vm0, %v583_v15 }
  0x7a   :  { %543 = vmatmul.msk.bf16.gmra.mxu1 %vm97_vm0, %v583_v15 }
  0x7b   :  { %559 = vmatmul.msk.bf16.gmra.mxu2 %vm97_vm0, %v583_v15 }
  0x7c   :  { %575 = vmatmul.msk.bf16.gmra.mxu3 %vm97_vm0, %v583_v15 }
  0x86   :  { %v131_v16 = vpop.f32.mrf.mxu0 }
  0x87   :  { %v229_v17 = vpop.f32.mrf.mxu1  ;;  %v171_v18 = vpack.c.bf16 %v131_v16, %v131_v16 }
  0x88   :  { %270 = vst.msk [vmem:[%s978_s6] sm:$0xff] %vm269_vm1, %v229_v17 }
  0x89   :  { %188 = vst.msk [vmem:[%s979_s5] sm:$0xf] %vm187_vm2, %v171_v18 }
  0x8e   :  { %v311_v19 = vpop.f32.mrf.mxu2  ;;  %v133_v22 = vpop.f32.mrf.mxu0 }
  0x8f   :  { %v392_v20 = vpop.f32.mrf.mxu3  ;;  %351 = vst.msk [vmem:[%s980_s7] sm:$0xff] %vm269_vm1, %v311_v19  ;;  %v231_v23 = vpop.f32.mrf.mxu1  ;;  %v172_v24 = vpack.c.bf16 %v133_v22, %v133_v22 }
  0x90   :  { %v432_v21 = vpack.c.bf16 %v392_v20, %v392_v20  ;;  %271 = vst.msk [vmem:[%s978_s6 + $0x8] sm:$0xff] %vm269_vm1, %v231_v23 }
  0x91   :  { %189 = vst.msk [vmem:[%s979_s5 + $0x4] sm:$0xf] %vm187_vm2, %v172_v24 }
  0x92   :  { %448 = vst.msk [vmem:[%s981_s8] sm:$0xf] %vm187_vm2, %v432_v21 }
  0x96   :  { %v313_v25 = vpop.f32.mrf.mxu2  ;;  %v136_v28 = vpop.f32.mrf.mxu0 }
  0x97   :  { %v394_v26 = vpop.f32.mrf.mxu3  ;;  %352 = vst.msk [vmem:[%s980_s7 + $0x8] sm:$0xff] %vm269_vm1, %v313_v25  ;;  %v234_v29 = vpop.f32.mrf.mxu1  ;;  %v173_v30 = vpack.c.bf16 %v136_v28, %v136_v28 }
  0x98   :  { %v433_v27 = vpack.c.bf16 %v394_v26, %v394_v26  ;;  %272 = vst.msk [vmem:[%s978_s6 + $0x10] sm:$0xff] %vm269_vm1, %v234_v29 }
  0x99   :  { %190 = vst.msk [vmem:[%s979_s5 + $0x8] sm:$0xf] %vm187_vm2, %v173_v30 }
  0x9a   :  { %449 = vst.msk [vmem:[%s981_s8 + $0x4] sm:$0xf] %vm187_vm2, %v433_v27 }
  0x9e   :  { %v316_v31 = vpop.f32.mrf.mxu2  ;;  %v138_v34 = vpop.f32.mrf.mxu0 }
  0x9f   :  { %v397_v32 = vpop.f32.mrf.mxu3  ;;  %353 = vst.msk [vmem:[%s980_s7 + $0x10] sm:$0xff] %vm269_vm1, %v316_v31  ;;  %v236_v35 = vpop.f32.mrf.mxu1  ;;  %v174_v36 = vpack.c.bf16 %v138_v34, %v138_v34 }
  0xa0   :  { %v434_v33 = vpack.c.bf16 %v397_v32, %v397_v32  ;;  %273 = vst.msk [vmem:[%s978_s6 + $0x18] sm:$0xff] %vm269_vm1, %v236_v35 }
  0xa1   :  { %191 = vst.msk [vmem:[%s979_s5 + $0xc] sm:$0xf] %vm187_vm2, %v174_v36 }
  0xa2   :  { %450 = vst.msk [vmem:[%s981_s8 + $0x8] sm:$0xf] %vm187_vm2, %v434_v33 }
  0xa6   :  { %v318_v37 = vpop.f32.mrf.mxu2  ;;  %v141_v40 = vpop.f32.mrf.mxu0 }
  0xa7   :  { %v399_v38 = vpop.f32.mrf.mxu3  ;;  %354 = vst.msk [vmem:[%s980_s7 + $0x18] sm:$0xff] %vm269_vm1, %v318_v37  ;;  %v239_v41 = vpop.f32.mrf.mxu1  ;;  %v175_v42 = vpack.c.bf16 %v141_v40, %v141_v40 }
  0xa8   :  { %v435_v39 = vpack.c.bf16 %v399_v38, %v399_v38  ;;  %274 = vst.msk [vmem:[%s978_s6 + $0x20] sm:$0xff] %vm269_vm1, %v239_v41 }
  0xa9   :  { %192 = vst.msk [vmem:[%s979_s5 + $0x10] sm:$0xf] %vm187_vm2, %v175_v42 }
  0xaa   :  { %451 = vst.msk [vmem:[%s981_s8 + $0xc] sm:$0xf] %vm187_vm2, %v435_v39 }
  0xae   :  { %v321_v43 = vpop.f32.mrf.mxu2  ;;  %v143_v46 = vpop.f32.mrf.mxu0 }
  0xaf   :  { %v402_v44 = vpop.f32.mrf.mxu3  ;;  %355 = vst.msk [vmem:[%s980_s7 + $0x20] sm:$0xff] %vm269_vm1, %v321_v43  ;;  %v241_v47 = vpop.f32.mrf.mxu1  ;;  %v176_v48 = vpack.c.bf16 %v143_v46, %v143_v46 }
  0xb0   :  { %v436_v45 = vpack.c.bf16 %v402_v44, %v402_v44  ;;  %275 = vst.msk [vmem:[%s978_s6 + $0x28] sm:$0xff] %vm269_vm1, %v241_v47 }
  0xb1   :  { %193 = vst.msk [vmem:[%s979_s5 + $0x14] sm:$0xf] %vm187_vm2, %v176_v48 }
  0xb2   :  { %452 = vst.msk [vmem:[%s981_s8 + $0x10] sm:$0xf] %vm187_vm2, %v436_v45 }
  0xb6   :  { %v323_v49 = vpop.f32.mrf.mxu2  ;;  %v146_v52 = vpop.f32.mrf.mxu0 }
  0xb7   :  { %v404_v50 = vpop.f32.mrf.mxu3  ;;  %356 = vst.msk [vmem:[%s980_s7 + $0x28] sm:$0xff] %vm269_vm1, %v323_v49  ;;  %v244_v53 = vpop.f32.mrf.mxu1  ;;  %v177_v54 = vpack.c.bf16 %v146_v52, %v146_v52 }
  0xb8   :  { %v437_v51 = vpack.c.bf16 %v404_v50, %v404_v50  ;;  %276 = vst.msk [vmem:[%s978_s6 + $0x30] sm:$0xff] %vm269_vm1, %v244_v53 }
  0xb9   :  { %194 = vst.msk [vmem:[%s979_s5 + $0x18] sm:$0xf] %vm187_vm2, %v177_v54 }
  0xba   :  { %453 = vst.msk [vmem:[%s981_s8 + $0x14] sm:$0xf] %vm187_vm2, %v437_v51 }
  0xbe   :  { %v326_v55 = vpop.f32.mrf.mxu2  ;;  %v148_v58 = vpop.f32.mrf.mxu0 }
  0xbf   :  { %v407_v56 = vpop.f32.mrf.mxu3  ;;  %357 = vst.msk [vmem:[%s980_s7 + $0x30] sm:$0xff] %vm269_vm1, %v326_v55  ;;  %v246_v59 = vpop.f32.mrf.mxu1  ;;  %v178_v60 = vpack.c.bf16 %v148_v58, %v148_v58 }
  0xc0   :  { %v438_v57 = vpack.c.bf16 %v407_v56, %v407_v56  ;;  %277 = vst.msk [vmem:[%s978_s6 + $0x38] sm:$0xff] %vm269_vm1, %v246_v59 }
  0xc1   :  { %195 = vst.msk [vmem:[%s979_s5 + $0x1c] sm:$0xf] %vm187_vm2, %v178_v60 }
  0xc2   :  { %454 = vst.msk [vmem:[%s981_s8 + $0x18] sm:$0xf] %vm187_vm2, %v438_v57 }
  0xc6   :  { %v328_v61 = vpop.f32.mrf.mxu2  ;;  %v151_v0 = vpop.f32.mrf.mxu0 }
  0xc7   :  { %v409_v62 = vpop.f32.mrf.mxu3  ;;  %358 = vst.msk [vmem:[%s980_s7 + $0x38] sm:$0xff] %vm269_vm1, %v328_v61  ;;  %v249_v1 = vpop.f32.mrf.mxu1  ;;  %v179_v2 = vpack.c.bf16 %v151_v0, %v151_v0 }
  0xc8   :  { %v439_v63 = vpack.c.bf16 %v409_v62, %v409_v62  ;;  %278 = vst.msk [vmem:[%s978_s6 + $0x40] sm:$0xff] %vm269_vm1, %v249_v1 }
  0xc9   :  { %196 = vst.msk [vmem:[%s979_s5 + $0x20] sm:$0xf] %vm187_vm2, %v179_v2 }
  0xca   :  { %455 = vst.msk [vmem:[%s981_s8 + $0x1c] sm:$0xf] %vm187_vm2, %v439_v63 }
  0xce   :  { %v331_v3 = vpop.f32.mrf.mxu2  ;;  %v153_v6 = vpop.f32.mrf.mxu0 }
  0xcf   :  { %v412_v4 = vpop.f32.mrf.mxu3  ;;  %359 = vst.msk [vmem:[%s980_s7 + $0x40] sm:$0xff] %vm269_vm1, %v331_v3  ;;  %v251_v7 = vpop.f32.mrf.mxu1  ;;  %v180_v8 = vpack.c.bf16 %v153_v6, %v153_v6 }
  0xd0   :  { %v440_v5 = vpack.c.bf16 %v412_v4, %v412_v4  ;;  %279 = vst.msk [vmem:[%s978_s6 + $0x48] sm:$0xff] %vm269_vm1, %v251_v7 }
  0xd1   :  { %197 = vst.msk [vmem:[%s979_s5 + $0x24] sm:$0xf] %vm187_vm2, %v180_v8 }
  0xd2   :  { %456 = vst.msk [vmem:[%s981_s8 + $0x20] sm:$0xf] %vm187_vm2, %v440_v5 }
  0xd6   :  { %v333_v9 = vpop.f32.mrf.mxu2  ;;  %v156_v12 = vpop.f32.mrf.mxu0 }
  0xd7   :  { %v414_v10 = vpop.f32.mrf.mxu3  ;;  %360 = vst.msk [vmem:[%s980_s7 + $0x48] sm:$0xff] %vm269_vm1, %v333_v9  ;;  %v254_v13 = vpop.f32.mrf.mxu1  ;;  %v181_v14 = vpack.c.bf16 %v156_v12, %v156_v12 }
  0xd8   :  { %v441_v11 = vpack.c.bf16 %v414_v10, %v414_v10  ;;  %280 = vst.msk [vmem:[%s978_s6 + $0x50] sm:$0xff] %vm269_vm1, %v254_v13 }
  0xd9   :  { %198 = vst.msk [vmem:[%s979_s5 + $0x28] sm:$0xf] %vm187_vm2, %v181_v14 }
  0xda   :  { %457 = vst.msk [vmem:[%s981_s8 + $0x24] sm:$0xf] %vm187_vm2, %v441_v11 }
  0xde   :  { %v336_v15 = vpop.f32.mrf.mxu2  ;;  %v158_v18 = vpop.f32.mrf.mxu0 }
  0xdf   :  { %v417_v16 = vpop.f32.mrf.mxu3  ;;  %361 = vst.msk [vmem:[%s980_s7 + $0x50] sm:$0xff] %vm269_vm1, %v336_v15  ;;  %v256_v19 = vpop.f32.mrf.mxu1  ;;  %v182_v20 = vpack.c.bf16 %v158_v18, %v158_v18 }
  0xe0   :  { %v442_v17 = vpack.c.bf16 %v417_v16, %v417_v16  ;;  %281 = vst.msk [vmem:[%s978_s6 + $0x58] sm:$0xff] %vm269_vm1, %v256_v19 }
  0xe1   :  { %199 = vst.msk [vmem:[%s979_s5 + $0x2c] sm:$0xf] %vm187_vm2, %v182_v20 }
  0xe2   :  { %458 = vst.msk [vmem:[%s981_s8 + $0x28] sm:$0xf] %vm187_vm2, %v442_v17 }
  0xe6   :  { %v338_v21 = vpop.f32.mrf.mxu2  ;;  %v161_v24 = vpop.f32.mrf.mxu0 }
  0xe7   :  { %v419_v22 = vpop.f32.mrf.mxu3  ;;  %362 = vst.msk [vmem:[%s980_s7 + $0x58] sm:$0xff] %vm269_vm1, %v338_v21  ;;  %v259_v25 = vpop.f32.mrf.mxu1  ;;  %v183_v26 = vpack.c.bf16 %v161_v24, %v161_v24 }
  0xe8   :  { %v443_v23 = vpack.c.bf16 %v419_v22, %v419_v22  ;;  %282 = vst.msk [vmem:[%s978_s6 + $0x60] sm:$0xff] %vm269_vm1, %v259_v25 }
  0xe9   :  { %200 = vst.msk [vmem:[%s979_s5 + $0x30] sm:$0xf] %vm187_vm2, %v183_v26 }
  0xea   :  { %459 = vst.msk [vmem:[%s981_s8 + $0x2c] sm:$0xf] %vm187_vm2, %v443_v23 }
  0xee   :  { %v341_v27 = vpop.f32.mrf.mxu2  ;;  %v163_v30 = vpop.f32.mrf.mxu0 }
  0xef   :  { %v422_v28 = vpop.f32.mrf.mxu3  ;;  %363 = vst.msk [vmem:[%s980_s7 + $0x60] sm:$0xff] %vm269_vm1, %v341_v27  ;;  %v261_v31 = vpop.f32.mrf.mxu1  ;;  %v184_v32 = vpack.c.bf16 %v163_v30, %v163_v30 }
  0xf0   :  { %v444_v29 = vpack.c.bf16 %v422_v28, %v422_v28  ;;  %283 = vst.msk [vmem:[%s978_s6 + $0x68] sm:$0xff] %vm269_vm1, %v261_v31 }
  0xf1   :  { %201 = vst.msk [vmem:[%s979_s5 + $0x34] sm:$0xf] %vm187_vm2, %v184_v32 }
  0xf2   :  { %460 = vst.msk [vmem:[%s981_s8 + $0x30] sm:$0xf] %vm187_vm2, %v444_v29 }
  0xf6   :  { %v343_v33 = vpop.f32.mrf.mxu2  ;;  %v166_v36 = vpop.f32.mrf.mxu0 }
  0xf7   :  { %v424_v34 = vpop.f32.mrf.mxu3  ;;  %364 = vst.msk [vmem:[%s980_s7 + $0x68] sm:$0xff] %vm269_vm1, %v343_v33  ;;  %v264_v37 = vpop.f32.mrf.mxu1  ;;  %v185_v38 = vpack.c.bf16 %v166_v36, %v166_v36 }
  0xf8   :  { %v445_v35 = vpack.c.bf16 %v424_v34, %v424_v34  ;;  %284 = vst.msk [vmem:[%s978_s6 + $0x70] sm:$0xff] %vm269_vm1, %v264_v37 }
  0xf9   :  { %202 = vst.msk [vmem:[%s979_s5 + $0x38] sm:$0xf] %vm187_vm2, %v185_v38 }
  0xfa   :  { %461 = vst.msk [vmem:[%s981_s8 + $0x34] sm:$0xf] %vm187_vm2, %v445_v35 }
  0xfe   :  { %v346_v39 = vpop.f32.mrf.mxu2  ;;  %v168_v42 = vpop.f32.mrf.mxu0 }
  0xff   :  { %v427_v40 = vpop.f32.mrf.mxu3  ;;  %365 = vst.msk [vmem:[%s980_s7 + $0x70] sm:$0xff] %vm269_vm1, %v346_v39  ;;  %v266_v43 = vpop.f32.mrf.mxu1  ;;  %v186_v44 = vpack.c.bf16 %v168_v42, %v168_v42 }
 0x100   :  { %v446_v41 = vpack.c.bf16 %v427_v40, %v427_v40  ;;  %285 = vst.msk [vmem:[%s978_s6 + $0x78] sm:$0xff] %vm269_vm1, %v266_v43 }
 0x101   :  { %203 = vst.msk [vmem:[%s979_s5 + $0x3c] sm:$0xf] %vm187_vm2, %v186_v44 }
 0x102   :  { %462 = vst.msk [vmem:[%s981_s8 + $0x38] sm:$0xf] %vm187_vm2, %v446_v41 }
 0x106   :  { %v348_v45 = vpop.f32.mrf.mxu2 }
 0x107   :  { %v429_v46 = vpop.f32.mrf.mxu3  ;;  %366 = vst.msk [vmem:[%s980_s7 + $0x78] sm:$0xff] %vm269_vm1, %v348_v45 }
 0x108   :  { %v447_v47 = vpack.c.bf16 %v429_v46, %v429_v46 }
 0x10a   :  { %463 = vst.msk [vmem:[%s981_s8 + $0x3c] sm:$0xf] %vm187_vm2, %v447_v47 }

</bundles_post_ra>
